<compile_context>
chip_gen: v7x
topology: tpu7x:2x2x1
jax: 0.10.0
libtpu: 0.0.40
codegen_flags: <defaults>
</compile_context>

<pallas_src>
import jax
import jax.numpy as jnp
from jax.experimental import pallas as pl
from jax.experimental.pallas import tpu as pltpu


def resblock_kernel(x_ref, scale1_ref, shift1_ref, w1_ref, w2_ref,
                    shift2_ref, b2_ref, out_ref, yh_ref, he_ref, ho_ref):
    # x_ref:  (W, TB, C)   bf16          out_ref: (Wout, TB, C) bf16
    # yh_ref: (W+2, TB, C) bf16  scratch: y with a zero halo row at each end
    # he_ref: (Wout, TB, C) bf16 scratch: h at even W positions
    # ho_ref: (Wout+1, TB, C) bf16 scratch: zero row, then h at odd positions
    W, TB, C = x_ref.shape
    Wout = out_ref.shape[0]
    M1 = W * TB
    M2 = Wout * TB

    # Halo rows are only ever written with zeros; do it unconditionally (tiny
    # stores) so the kernel stays correct when the parallel grid is split
    # across TensorCores (each core has its own scratch).
    zplane = jnp.zeros((TB, C), jnp.bfloat16)
    yh_ref[0] = zplane
    yh_ref[W + 1] = zplane
    ho_ref[0] = zplane

    # ---- BatchNorm1 (eval, folded to scale/shift) + ReLU, in f32 -----------
    x = x_ref[...].astype(jnp.float32)                         # (W, TB, C)
    y = jnp.maximum(x * scale1_ref[0] + shift1_ref[0], 0.0)

    # ---- residual = MaxPool2d((1,2)): pairwise max along W -----------------
    y_pairs = y.reshape(Wout, 2, TB, C)
    residual = jnp.maximum(y_pairs[:, 0], y_pairs[:, 1]).reshape(M2, C)

    # ---- Conv2d(c,c,(1,3),pad=(0,1)) via the zero-halo buffer --------------
    # h[w] = y[w-1] @ w1[0] + y[w] @ w1[1] + y[w+1] @ w1[2]
    yh_ref[pl.ds(1, W)] = y.astype(jnp.bfloat16)
    h = jnp.dot(yh_ref[pl.ds(0, W)].reshape(M1, C), w1_ref[0],
                preferred_element_type=jnp.float32)
    h = h + jnp.dot(yh_ref[pl.ds(1, W)].reshape(M1, C), w1_ref[1],
                    preferred_element_type=jnp.float32)
    h = h + jnp.dot(yh_ref[pl.ds(2, W)].reshape(M1, C), w1_ref[2],
                    preferred_element_type=jnp.float32)

    # ---- BatchNorm2 + ReLU (scale folded into w1, conv1 bias into shift2) --
    # Dropout2d(0.2) is the identity in eval mode.
    h = jnp.maximum(h + shift2_ref[0], 0.0)                    # (M1, C) f32

    # ---- Conv2d(c,c,(1,3),stride=(1,2),pad=(0,1)): even/odd buffers --------
    # g[w] = h[2w-1] @ w2[0] + h[2w] @ w2[1] + h[2w+1] @ w2[2]
    h_pairs = h.astype(jnp.bfloat16).reshape(Wout, 2, TB, C)
    he_ref[...] = h_pairs[:, 0]                    # h[2w]
    ho_ref[pl.ds(1, Wout)] = h_pairs[:, 1]         # h[2w+1]; ho_ref[0] stays 0

    g = jnp.dot(ho_ref[pl.ds(0, Wout)].reshape(M2, C), w2_ref[0],     # h[2w-1]
                preferred_element_type=jnp.float32)
    g = g + jnp.dot(he_ref[...].reshape(M2, C), w2_ref[1],            # h[2w]
                    preferred_element_type=jnp.float32)
    g = g + jnp.dot(ho_ref[pl.ds(1, Wout)].reshape(M2, C), w2_ref[2],  # h[2w+1]
                    preferred_element_type=jnp.float32)
    g = g + b2_ref[0] + residual

    out_ref[...] = g.reshape(Wout, TB, C).astype(out_ref.dtype)


def resblock_meg1(x, scale1, shift1, w1, b1, scale2, shift2, w2, b2,
                  *, block_b=128):
    """x: (N, C, H, W) float32, NCHW (PyTorch convention). W must be even."""
    N, C, H, W = x.shape
    assert W % 2 == 0, "W must be even (as required by the PyTorch module)"
    Wout = W // 2
    B = N * H

    # ---- generation-aware VMEM limit (128 MiB on v5e/v6e, 64 MiB on v7x) ---
    try:
        vmem_cap = int(pltpu.get_tpu_info().vmem_capacity_bytes)
    except Exception:
        vmem_cap = 64 * 1024 * 1024
    vmem_limit = int(min((vmem_cap * 3) // 4, 100 * 1024 * 1024))

    # ---- row tile TB: multiple of 8, bounded by a per-step VMEM budget -----
    # ~32 live bytes per W*TB*C element (double-buffered bf16 I/O blocks,
    # bf16 halo/even/odd scratch, f32 temps).
    bytes_per_elem = 32
    tb_budget = max(8, (vmem_limit // 2) // (bytes_per_elem * W * C))
    TB = max(8, (min(block_b, tb_budget, ((B + 7) // 8) * 8) // 8) * 8)
    # Keep a handful of grid steps alive for megacore sharding / pipelining.
    min_steps = 4
    if (B + TB - 1) // TB < min_steps:
        TB = max(8, min(TB, ((((B + min_steps - 1) // min_steps) + 7) // 8) * 8))
    B_pad = ((B + TB - 1) // TB) * TB

    # NCHW -> (W, B, C) bf16 streaming layout (transpose + cast fuse in XLA).
    x_r = jnp.transpose(x, (3, 0, 2, 1)).reshape(W, B, C).astype(jnp.bfloat16)
    if B_pad != B:
        x_r = jnp.pad(x_r, ((0, 0), (0, B_pad - B), (0, 0)))

    # Fold BN2 scale into conv1 weights and conv1 bias into BN2 shift.
    scale2 = scale2.reshape(C).astype(jnp.float32)
    w1_f = (w1.astype(jnp.float32) * scale2[None, None, :]).astype(jnp.bfloat16)
    w2_f = w2.astype(jnp.bfloat16)
    shift2_f = (b1.reshape(C).astype(jnp.float32) * scale2
                + shift2.reshape(C).astype(jnp.float32)).reshape(1, C)
    scale1 = scale1.reshape(1, C).astype(jnp.float32)
    shift1 = shift1.reshape(1, C).astype(jnp.float32)
    b2 = b2.reshape(1, C).astype(jnp.float32)

    grid_spec = pltpu.PrefetchScalarGridSpec(
        num_scalar_prefetch=0,
        grid=(B_pad // TB,),
        in_specs=[
            pl.BlockSpec((W, TB, C), lambda b: (0, b, 0)),     # x (bf16)
            pl.BlockSpec((1, C), lambda b: (0, 0)),            # scale1
            pl.BlockSpec((1, C), lambda b: (0, 0)),            # shift1
            pl.BlockSpec((3, C, C), lambda b: (0, 0, 0)),      # w1 (bf16, BN2 folded)
            pl.BlockSpec((3, C, C), lambda b: (0, 0, 0)),      # w2 (bf16)
            pl.BlockSpec((1, C), lambda b: (0, 0)),            # shift2 (b1 folded)
            pl.BlockSpec((1, C), lambda b: (0, 0)),            # b2
        ],
        out_specs=pl.BlockSpec((Wout, TB, C), lambda b: (0, b, 0)),
        scratch_shapes=[
            pltpu.VMEM((W + 2, TB, C), jnp.bfloat16),          # y + zero halo
            pltpu.VMEM((Wout, TB, C), jnp.bfloat16),           # h even rows
            pltpu.VMEM((Wout + 1, TB, C), jnp.bfloat16),       # h odd rows + halo
        ],
    )

    out_r = pl.pallas_call(
        resblock_kernel,
        out_shape=jax.ShapeDtypeStruct((Wout, B_pad, C), jnp.bfloat16),
        grid_spec=grid_spec,
        compiler_params=pltpu.CompilerParams(
            dimension_semantics=("parallel",),
            vmem_limit_bytes=vmem_limit),
    )(x_r, scale1, shift1, w1_f, w2_f, shift2_f, b2)

    out_r = out_r[:, :B, :]
    # (Wout, B, C) -> NCHW f32.  Callers that can consume the (W, B, C)
    # layout directly should skip this relayout entirely.
    return jnp.transpose(out_r.reshape(Wout, N, H, C), (1, 3, 2, 0)).astype(jnp.float32)


# ------------------------------ reference (pure JAX, NCHW, f32) --------------
def reference(x, g1, be1, m1, v1, wt1, bb1, g2, be2, m2, v2, wt2, bb2):
    eps = 1e-5
    N, C, H, W = x.shape
    Wout = W // 2

    def bn(z, g, be, m, v):
        return (g / jnp.sqrt(v + eps))[None, :, None, None] * \
               (z - m[None, :, None, None]) + be[None, :, None, None]

    y = jnp.maximum(bn(x, g1, be1, m1, v1), 0.0)
    residual = y.reshape(N, C, H, Wout, 2).max(axis=-1)

    ypad = jnp.pad(y, ((0, 0), (0, 0), (0, 0), (1, 1)))
    h = sum(jnp.einsum('nchw,oc->nohw', ypad[:, :, :, k:k + W],
                       wt1[:, :, 0, k], precision='highest') for k in range(3))
    h = h + bb1[None, :, None, None]
    h = jnp.maximum(bn(h, g2, be2, m2, v2), 0.0)

    hpad = jnp.pad(h, ((0, 0), (0, 0), (0, 0), (1, 1)))
    o = sum(jnp.einsum('nchw,oc->nohw', hpad[:, :, :, k:k + 2 * Wout:2],
                       wt2[:, :, 0, k], precision='highest') for k in range(3))
    o = o + bb2[None, :, None, None]
    return o + residual


if __name__ == "__main__":
    N, C, H, W = 4, 32, 8, 16          # small shapes; module default is c=224
    key = jax.random.PRNGKey(0)
    ks = jax.random.split(key, 16)

    x = jax.random.normal(ks[0], (N, C, H, W), jnp.float32)

    # deterministic synthetic parameters (PyTorch shapes)
    g1 = jax.random.uniform(ks[1], (C,), jnp.float32, 0.5, 1.5)
    be1 = jax.random.normal(ks[2], (C,), jnp.float32) * 0.1
    m1 = jax.random.normal(ks[3], (C,), jnp.float32) * 0.1
    v1 = jax.random.uniform(ks[4], (C,), jnp.float32, 0.5, 1.5)
    wt1 = jax.random.normal(ks[5], (C, C, 1, 3), jnp.float32) * 0.1   # OIHW
    bb1 = jax.random.normal(ks[6], (C,), jnp.float32) * 0.1
    g2 = jax.random.uniform(ks[7], (C,), jnp.float32, 0.5, 1.5)
    be2 = jax.random.normal(ks[8], (C,), jnp.float32) * 0.1
    m2 = jax.random.normal(ks[9], (C,), jnp.float32) * 0.1
    v2 = jax.random.uniform(ks[10], (C,), jnp.float32, 0.5, 1.5)
    wt2 = jax.random.normal(ks[11], (C, C, 1, 3), jnp.float32) * 0.1  # OIHW
    bb2 = jax.random.normal(ks[12], (C,), jnp.float32) * 0.1

    eps = 1e-5
    # fold BN (eval mode) into scale/shift; conv weights OIHW -> (k, Cin, Cout)
    scale1 = g1 / jnp.sqrt(v1 + eps)
    shift1 = be1 - m1 * scale1
    scale2 = g2 / jnp.sqrt(v2 + eps)
    shift2 = be2 - m2 * scale2
    w1 = jnp.transpose(wt1[:, :, 0, :], (2, 1, 0))   # (3, Cin, Cout)
    w2 = jnp.transpose(wt2[:, :, 0, :], (2, 1, 0))   # (3, Cin, Cout)

    # block_b=8 forces a 4-step grid over B = N*H = 32 (exercises tiling).
    out = resblock_meg1(x, scale1, shift1, w1, bb1, scale2, shift2, w2, bb2,
                        block_b=8)
    out = jax.block_until_ready(out)

    ref = reference(x, g1, be1, m1, v1, wt1, bb1, g2, be2, m2, v2, wt2, bb2)
    assert out.shape == (N, C, H, W // 2), out.shape
    err = float(jnp.max(jnp.abs(out - ref)))
    # bf16 streaming I/O + bf16 MXU operands -> slightly looser tolerance.
    assert jnp.allclose(out, ref, rtol=3e-2, atol=3e-2), err

    print("KERNEL_OK")
</pallas_src>

<mosaic_0001>
module attributes {stable_mosaic.version = 11 : i64} {
  func.func @resblock_kernel(%arg0: i32, %arg1: memref<16x8x32xbf16, #tpu.memory_space<vmem>>, %arg2: memref<1x32xf32, #tpu.memory_space<vmem>>, %arg3: memref<1x32xf32, #tpu.memory_space<vmem>>, %arg4: memref<3x32x32xbf16, #tpu.memory_space<vmem>>, %arg5: memref<3x32x32xbf16, #tpu.memory_space<vmem>>, %arg6: memref<1x32xf32, #tpu.memory_space<vmem>>, %arg7: memref<1x32xf32, #tpu.memory_space<vmem>>, %arg8: memref<8x8x32xbf16, #tpu.memory_space<vmem>>, %arg9: memref<18x8x32xbf16, #tpu.memory_space<vmem>>, %arg10: memref<8x8x32xbf16, #tpu.memory_space<vmem>>, %arg11: memref<9x8x32xbf16, #tpu.memory_space<vmem>>) attributes {dimension_semantics = [#tpu.dimension_semantics<parallel>], iteration_bounds = array<i64: 4>, scalar_prefetch = 0 : i64, scratch_operands = 3 : i64, tpu.core_type = #tpu.core_type<tc>, window_params = [{transform_indices = @transform_0, window_bounds = array<i64: 16, 8, 32>}, {pipeline_mode = #tpu.pipeline_mode<synchronous>, transform_indices = @transform_1, window_bounds = array<i64: 1, 32>}, {pipeline_mode = #tpu.pipeline_mode<synchronous>, transform_indices = @transform_2, window_bounds = array<i64: 1, 32>}, {pipeline_mode = #tpu.pipeline_mode<synchronous>, transform_indices = @transform_3, window_bounds = array<i64: 3, 32, 32>}, {pipeline_mode = #tpu.pipeline_mode<synchronous>, transform_indices = @transform_4, window_bounds = array<i64: 3, 32, 32>}, {pipeline_mode = #tpu.pipeline_mode<synchronous>, transform_indices = @transform_5, window_bounds = array<i64: 1, 32>}, {pipeline_mode = #tpu.pipeline_mode<synchronous>, transform_indices = @transform_6, window_bounds = array<i64: 1, 32>}, {transform_indices = @transform_7, window_bounds = array<i64: 8, 8, 32>}]} {
    %cst = arith.constant 0.000000e+00 : bf16
    %0 = vector.broadcast %cst : bf16 to vector<8x32xbf16>
    %c0 = arith.constant 0 : index
    %c0_0 = arith.constant 0 : index
    %c0_1 = arith.constant 0 : index
    %1 = vector.load %arg9[%c0, %c0_0, %c0_1] : memref<18x8x32xbf16, #tpu.memory_space<vmem>>, vector<1x8x32xbf16>
    %2 = vector.shape_cast %1 : vector<1x8x32xbf16> to vector<8x32xbf16>
    %3 = vector.shape_cast %0 : vector<8x32xbf16> to vector<1x8x32xbf16>
    tpu.vector_store %arg9[%c0, %c0_0, %c0_1], %3 {strides = array<i32>} : memref<18x8x32xbf16, #tpu.memory_space<vmem>>, vector<1x8x32xbf16>,
    %c17 = arith.constant 17 : index
    %c0_2 = arith.constant 0 : index
    %c0_3 = arith.constant 0 : index
    %4 = vector.load %arg9[%c17, %c0_2, %c0_3] : memref<18x8x32xbf16, #tpu.memory_space<vmem>>, vector<1x8x32xbf16>
    %5 = vector.shape_cast %4 : vector<1x8x32xbf16> to vector<8x32xbf16>
    %6 = vector.shape_cast %0 : vector<8x32xbf16> to vector<1x8x32xbf16>
    tpu.vector_store %arg9[%c17, %c0_2, %c0_3], %6 {strides = array<i32>} : memref<18x8x32xbf16, #tpu.memory_space<vmem>>, vector<1x8x32xbf16>,
    %c0_4 = arith.constant 0 : index
    %c0_5 = arith.constant 0 : index
    %c0_6 = arith.constant 0 : index
    %7 = vector.load %arg11[%c0_4, %c0_5, %c0_6] : memref<9x8x32xbf16, #tpu.memory_space<vmem>>, vector<1x8x32xbf16>
    %8 = vector.shape_cast %7 : vector<1x8x32xbf16> to vector<8x32xbf16>
    %9 = vector.shape_cast %0 : vector<8x32xbf16> to vector<1x8x32xbf16>
    tpu.vector_store %arg11[%c0_4, %c0_5, %c0_6], %9 {strides = array<i32>} : memref<9x8x32xbf16, #tpu.memory_space<vmem>>, vector<1x8x32xbf16>,
    %c0_7 = arith.constant 0 : index
    %c0_8 = arith.constant 0 : index
    %c0_9 = arith.constant 0 : index
    %10 = vector.load %arg1[%c0_7, %c0_8, %c0_9] : memref<16x8x32xbf16, #tpu.memory_space<vmem>>, vector<16x8x32xbf16>
    %11 = arith.extf %10 : vector<16x8x32xbf16> to vector<16x8x32xf32>
    %c0_10 = arith.constant 0 : index
    %c0_11 = arith.constant 0 : index
    %12 = vector.load %arg2[%c0_10, %c0_11] : memref<1x32xf32, #tpu.memory_space<vmem>>, vector<1x32xf32>
    %13 = vector.shape_cast %12 : vector<1x32xf32> to vector<32xf32>
    %14 = vector.shape_cast %13 : vector<32xf32> to vector<1x1x32xf32>
    %15 = vector.broadcast %14 : vector<1x1x32xf32> to vector<16x8x32xf32>
    %16 = arith.mulf %11, %15 : vector<16x8x32xf32>
    %c0_12 = arith.constant 0 : index
    %c0_13 = arith.constant 0 : index
    %17 = vector.load %arg3[%c0_12, %c0_13] : memref<1x32xf32, #tpu.memory_space<vmem>>, vector<1x32xf32>
    %18 = vector.shape_cast %17 : vector<1x32xf32> to vector<32xf32>
    %19 = vector.shape_cast %18 : vector<32xf32> to vector<1x1x32xf32>
    %20 = vector.broadcast %19 : vector<1x1x32xf32> to vector<16x8x32xf32>
    %21 = arith.addf %16, %20 : vector<16x8x32xf32>
    %cst_14 = arith.constant 0.000000e+00 : f32
    %22 = vector.broadcast %cst_14 : f32 to vector<16x8x32xf32>
    %23 = arith.maximumf %21, %22 : vector<16x8x32xf32>
    %24 = vector.shape_cast %23 : vector<16x8x32xf32> to vector<8x2x8x32xf32>
    %25 = vector.extract_strided_slice %24 {offsets = [0, 0, 0, 0], sizes = [8, 1, 8, 32], strides = [1, 1, 1, 1]} : vector<8x2x8x32xf32> to vector<8x1x8x32xf32>
    %26 = vector.shape_cast %25 : vector<8x1x8x32xf32> to vector<8x8x32xf32>
    %27 = vector.extract_strided_slice %24 {offsets = [0, 1, 0, 0], sizes = [8, 1, 8, 32], strides = [1, 1, 1, 1]} : vector<8x2x8x32xf32> to vector<8x1x8x32xf32>
    %28 = vector.shape_cast %27 : vector<8x1x8x32xf32> to vector<8x8x32xf32>
    %29 = arith.maximumf %26, %28 : vector<8x8x32xf32>
    %30 = vector.shape_cast %29 : vector<8x8x32xf32> to vector<64x32xf32>
    %31 = arith.truncf %23 : vector<16x8x32xf32> to vector<16x8x32xbf16>
    %c1 = arith.constant 1 : index
    %c0_15 = arith.constant 0 : index
    %c0_16 = arith.constant 0 : index
    %32 = vector.load %arg9[%c1, %c0_15, %c0_16] : memref<18x8x32xbf16, #tpu.memory_space<vmem>>, vector<16x8x32xbf16>
    tpu.vector_store %arg9[%c1, %c0_15, %c0_16], %31 {strides = array<i32>} : memref<18x8x32xbf16, #tpu.memory_space<vmem>>, vector<16x8x32xbf16>,
    %c0_17 = arith.constant 0 : index
    %c0_18 = arith.constant 0 : index
    %c0_19 = arith.constant 0 : index
    %33 = vector.load %arg9[%c0_17, %c0_18, %c0_19] : memref<18x8x32xbf16, #tpu.memory_space<vmem>>, vector<16x8x32xbf16>
    %34 = vector.shape_cast %33 : vector<16x8x32xbf16> to vector<128x32xbf16>
    %c0_20 = arith.constant 0 : index
    %c0_21 = arith.constant 0 : index
    %c0_22 = arith.constant 0 : index
    %35 = vector.load %arg4[%c0_20, %c0_21, %c0_22] : memref<3x32x32xbf16, #tpu.memory_space<vmem>>, vector<1x32x32xbf16>
    %36 = vector.shape_cast %35 : vector<1x32x32xbf16> to vector<32x32xbf16>
    %cst_23 = arith.constant dense<0.000000e+00> : vector<128x32xf32>
    %37 = tpu.matmul %34, %36, %cst_23 {dimension_numbers = #tpu.dot_dimension_numbers<[1], [0], [0], [1], [0, 0, 1, 1], [], []>} : vector<128x32xbf16>, vector<32x32xbf16>, vector<128x32xf32> -> vector<128x32xf32>
    %c1_24 = arith.constant 1 : index
    %c0_25 = arith.constant 0 : index
    %c0_26 = arith.constant 0 : index
    %38 = vector.load %arg9[%c1_24, %c0_25, %c0_26] : memref<18x8x32xbf16, #tpu.memory_space<vmem>>, vector<16x8x32xbf16>
    %39 = vector.shape_cast %38 : vector<16x8x32xbf16> to vector<128x32xbf16>
    %c1_27 = arith.constant 1 : index
    %c0_28 = arith.constant 0 : index
    %c0_29 = arith.constant 0 : index
    %40 = vector.load %arg4[%c1_27, %c0_28, %c0_29] : memref<3x32x32xbf16, #tpu.memory_space<vmem>>, vector<1x32x32xbf16>
    %41 = vector.shape_cast %40 : vector<1x32x32xbf16> to vector<32x32xbf16>
    %cst_30 = arith.constant dense<0.000000e+00> : vector<128x32xf32>
    %42 = tpu.matmul %39, %41, %cst_30 {dimension_numbers = #tpu.dot_dimension_numbers<[1], [0], [0], [1], [0, 0, 1, 1], [], []>} : vector<128x32xbf16>, vector<32x32xbf16>, vector<128x32xf32> -> vector<128x32xf32>
    %43 = arith.addf %37, %42 : vector<128x32xf32>
    %c2 = arith.constant 2 : index
    %c0_31 = arith.constant 0 : index
    %c0_32 = arith.constant 0 : index
    %44 = vector.load %arg9[%c2, %c0_31, %c0_32] : memref<18x8x32xbf16, #tpu.memory_space<vmem>>, vector<16x8x32xbf16>
    %45 = vector.shape_cast %44 : vector<16x8x32xbf16> to vector<128x32xbf16>
    %c2_33 = arith.constant 2 : index
    %c0_34 = arith.constant 0 : index
    %c0_35 = arith.constant 0 : index
    %46 = vector.load %arg4[%c2_33, %c0_34, %c0_35] : memref<3x32x32xbf16, #tpu.memory_space<vmem>>, vector<1x32x32xbf16>
    %47 = vector.shape_cast %46 : vector<1x32x32xbf16> to vector<32x32xbf16>
    %cst_36 = arith.constant dense<0.000000e+00> : vector<128x32xf32>
    %48 = tpu.matmul %45, %47, %cst_36 {dimension_numbers = #tpu.dot_dimension_numbers<[1], [0], [0], [1], [0, 0, 1, 1], [], []>} : vector<128x32xbf16>, vector<32x32xbf16>, vector<128x32xf32> -> vector<128x32xf32>
    %49 = arith.addf %43, %48 : vector<128x32xf32>
    %c0_37 = arith.constant 0 : index
    %c0_38 = arith.constant 0 : index
    %50 = vector.load %arg6[%c0_37, %c0_38] : memref<1x32xf32, #tpu.memory_space<vmem>>, vector<1x32xf32>
    %51 = vector.shape_cast %50 : vector<1x32xf32> to vector<32xf32>
    %52 = vector.shape_cast %51 : vector<32xf32> to vector<1x32xf32>
    %53 = vector.broadcast %52 : vector<1x32xf32> to vector<128x32xf32>
    %54 = arith.addf %49, %53 : vector<128x32xf32>
    %cst_39 = arith.constant 0.000000e+00 : f32
    %55 = vector.broadcast %cst_39 : f32 to vector<128x32xf32>
    %56 = arith.maximumf %54, %55 : vector<128x32xf32>
    %57 = arith.truncf %56 : vector<128x32xf32> to vector<128x32xbf16>
    %58 = vector.shape_cast %57 : vector<128x32xbf16> to vector<8x2x8x32xbf16>
    %59 = vector.extract_strided_slice %58 {offsets = [0, 0, 0, 0], sizes = [8, 1, 8, 32], strides = [1, 1, 1, 1]} : vector<8x2x8x32xbf16> to vector<8x1x8x32xbf16>
    %60 = vector.shape_cast %59 : vector<8x1x8x32xbf16> to vector<8x8x32xbf16>
    %c0_40 = arith.constant 0 : index
    %c0_41 = arith.constant 0 : index
    %c0_42 = arith.constant 0 : index
    %61 = vector.load %arg10[%c0_40, %c0_41, %c0_42] : memref<8x8x32xbf16, #tpu.memory_space<vmem>>, vector<8x8x32xbf16>
    tpu.vector_store %arg10[%c0_40, %c0_41, %c0_42], %60 {strides = array<i32>} : memref<8x8x32xbf16, #tpu.memory_space<vmem>>, vector<8x8x32xbf16>,
    %62 = vector.extract_strided_slice %58 {offsets = [0, 1, 0, 0], sizes = [8, 1, 8, 32], strides = [1, 1, 1, 1]} : vector<8x2x8x32xbf16> to vector<8x1x8x32xbf16>
    %63 = vector.shape_cast %62 : vector<8x1x8x32xbf16> to vector<8x8x32xbf16>
    %c1_43 = arith.constant 1 : index
    %c0_44 = arith.constant 0 : index
    %c0_45 = arith.constant 0 : index
    %64 = vector.load %arg11[%c1_43, %c0_44, %c0_45] : memref<9x8x32xbf16, #tpu.memory_space<vmem>>, vector<8x8x32xbf16>
    tpu.vector_store %arg11[%c1_43, %c0_44, %c0_45], %63 {strides = array<i32>} : memref<9x8x32xbf16, #tpu.memory_space<vmem>>, vector<8x8x32xbf16>,
    %c0_46 = arith.constant 0 : index
    %c0_47 = arith.constant 0 : index
    %c0_48 = arith.constant 0 : index
    %65 = vector.load %arg11[%c0_46, %c0_47, %c0_48] : memref<9x8x32xbf16, #tpu.memory_space<vmem>>, vector<8x8x32xbf16>
    %66 = vector.shape_cast %65 : vector<8x8x32xbf16> to vector<64x32xbf16>
    %c0_49 = arith.constant 0 : index
    %c0_50 = arith.constant 0 : index
    %c0_51 = arith.constant 0 : index
    %67 = vector.load %arg5[%c0_49, %c0_50, %c0_51] : memref<3x32x32xbf16, #tpu.memory_space<vmem>>, vector<1x32x32xbf16>
    %68 = vector.shape_cast %67 : vector<1x32x32xbf16> to vector<32x32xbf16>
    %cst_52 = arith.constant dense<0.000000e+00> : vector<64x32xf32>
    %69 = tpu.matmul %66, %68, %cst_52 {dimension_numbers = #tpu.dot_dimension_numbers<[1], [0], [0], [1], [0, 0, 1, 1], [], []>} : vector<64x32xbf16>, vector<32x32xbf16>, vector<64x32xf32> -> vector<64x32xf32>
    %c0_53 = arith.constant 0 : index
    %c0_54 = arith.constant 0 : index
    %c0_55 = arith.constant 0 : index
    %70 = vector.load %arg10[%c0_53, %c0_54, %c0_55] : memref<8x8x32xbf16, #tpu.memory_space<vmem>>, vector<8x8x32xbf16>
    %71 = vector.shape_cast %70 : vector<8x8x32xbf16> to vector<64x32xbf16>
    %c1_56 = arith.constant 1 : index
    %c0_57 = arith.constant 0 : index
    %c0_58 = arith.constant 0 : index
    %72 = vector.load %arg5[%c1_56, %c0_57, %c0_58] : memref<3x32x32xbf16, #tpu.memory_space<vmem>>, vector<1x32x32xbf16>
    %73 = vector.shape_cast %72 : vector<1x32x32xbf16> to vector<32x32xbf16>
    %cst_59 = arith.constant dense<0.000000e+00> : vector<64x32xf32>
    %74 = tpu.matmul %71, %73, %cst_59 {dimension_numbers = #tpu.dot_dimension_numbers<[1], [0], [0], [1], [0, 0, 1, 1], [], []>} : vector<64x32xbf16>, vector<32x32xbf16>, vector<64x32xf32> -> vector<64x32xf32>
    %75 = arith.addf %69, %74 : vector<64x32xf32>
    %c1_60 = arith.constant 1 : index
    %c0_61 = arith.constant 0 : index
    %c0_62 = arith.constant 0 : index
    %76 = vector.load %arg11[%c1_60, %c0_61, %c0_62] : memref<9x8x32xbf16, #tpu.memory_space<vmem>>, vector<8x8x32xbf16>
    %77 = vector.shape_cast %76 : vector<8x8x32xbf16> to vector<64x32xbf16>
    %c2_63 = arith.constant 2 : index
    %c0_64 = arith.constant 0 : index
    %c0_65 = arith.constant 0 : index
    %78 = vector.load %arg5[%c2_63, %c0_64, %c0_65] : memref<3x32x32xbf16, #tpu.memory_space<vmem>>, vector<1x32x32xbf16>
    %79 = vector.shape_cast %78 : vector<1x32x32xbf16> to vector<32x32xbf16>
    %cst_66 = arith.constant dense<0.000000e+00> : vector<64x32xf32>
    %80 = tpu.matmul %77, %79, %cst_66 {dimension_numbers = #tpu.dot_dimension_numbers<[1], [0], [0], [1], [0, 0, 1, 1], [], []>} : vector<64x32xbf16>, vector<32x32xbf16>, vector<64x32xf32> -> vector<64x32xf32>
    %81 = arith.addf %75, %80 : vector<64x32xf32>
    %c0_67 = arith.constant 0 : index
    %c0_68 = arith.constant 0 : index
    %82 = vector.load %arg7[%c0_67, %c0_68] : memref<1x32xf32, #tpu.memory_space<vmem>>, vector<1x32xf32>
    %83 = vector.shape_cast %82 : vector<1x32xf32> to vector<32xf32>
    %84 = vector.shape_cast %83 : vector<32xf32> to vector<1x32xf32>
    %85 = vector.broadcast %84 : vector<1x32xf32> to vector<64x32xf32>
    %86 = arith.addf %81, %85 : vector<64x32xf32>
    %87 = arith.addf %86, %30 : vector<64x32xf32>
    %88 = vector.shape_cast %87 : vector<64x32xf32> to vector<8x8x32xf32>
    %89 = arith.truncf %88 : vector<8x8x32xf32> to vector<8x8x32xbf16>
    %c0_69 = arith.constant 0 : index
    %c0_70 = arith.constant 0 : index
    %c0_71 = arith.constant 0 : index
    %90 = vector.load %arg8[%c0_69, %c0_70, %c0_71] : memref<8x8x32xbf16, #tpu.memory_space<vmem>>, vector<8x8x32xbf16>
    tpu.vector_store %arg8[%c0_69, %c0_70, %c0_71], %89 {strides = array<i32>} : memref<8x8x32xbf16, #tpu.memory_space<vmem>>, vector<8x8x32xbf16>,
    return
  }
  func.func @transform_0(%arg0: i32) -> (i32, i32, i32) {
    %c0_i32 = arith.constant 0 : i32
    %c0_i32_0 = arith.constant 0 : i32
    %c0_i32_1 = arith.constant 0 : i32
    return %c0_i32, %arg0, %c0_i32_0 : i32, i32, i32
  }
  func.func @transform_1(%arg0: i32) -> (i32, i32) {
    %c0_i32 = arith.constant 0 : i32
    %c0_i32_0 = arith.constant 0 : i32
    %c0_i32_1 = arith.constant 0 : i32
    return %c0_i32, %c0_i32_0 : i32, i32
  }
  func.func @transform_2(%arg0: i32) -> (i32, i32) {
    %c0_i32 = arith.constant 0 : i32
    %c0_i32_0 = arith.constant 0 : i32
    %c0_i32_1 = arith.constant 0 : i32
    return %c0_i32, %c0_i32_0 : i32, i32
  }
  func.func @transform_3(%arg0: i32) -> (i32, i32, i32) {
    %c0_i32 = arith.constant 0 : i32
    %c0_i32_0 = arith.constant 0 : i32
    %c0_i32_1 = arith.constant 0 : i32
    %c0_i32_2 = arith.constant 0 : i32
    return %c0_i32, %c0_i32_0, %c0_i32_1 : i32, i32, i32
  }
  func.func @transform_4(%arg0: i32) -> (i32, i32, i32) {
    %c0_i32 = arith.constant 0 : i32
    %c0_i32_0 = arith.constant 0 : i32
    %c0_i32_1 = arith.constant 0 : i32
    %c0_i32_2 = arith.constant 0 : i32
    return %c0_i32, %c0_i32_0, %c0_i32_1 : i32, i32, i32
  }
  func.func @transform_5(%arg0: i32) -> (i32, i32) {
    %c0_i32 = arith.constant 0 : i32
    %c0_i32_0 = arith.constant 0 : i32
    %c0_i32_1 = arith.constant 0 : i32
    return %c0_i32, %c0_i32_0 : i32, i32
  }
  func.func @transform_6(%arg0: i32) -> (i32, i32) {
    %c0_i32 = arith.constant 0 : i32
    %c0_i32_0 = arith.constant 0 : i32
    %c0_i32_1 = arith.constant 0 : i32
    return %c0_i32, %c0_i32_0 : i32, i32
  }
  func.func @transform_7(%arg0: i32) -> (i32, i32, i32) {
    %c0_i32 = arith.constant 0 : i32
    %c0_i32_0 = arith.constant 0 : i32
    %c0_i32_1 = arith.constant 0 : i32
    return %c0_i32, %arg0, %c0_i32_0 : i32, i32, i32
  }
}

</mosaic_0001>

<bundles_post_ra>
// kernel: tpu_custom_call.1
= control target key start
LH: loop header
LB: loop body
LE: loop exit
PB: predicated region body
PF: predicated region fallthrough
CT: control target
= control target key end

     0   :  { %12 = vsyncpa [#allocation6], 0  ;;  %s2903_s0 = inlined_call_operand.hbm [shape: bf16[16,32,32], index: 0, kind: input, shape index: {}]   ;;  %s2904_s1 = inlined_call_operand.vmem [shape: f32[1,32], index: 1, kind: input, shape index: {}]   ;;  %s2905_s2 = inlined_call_operand.vmem [shape: f32[1,32], index: 2, kind: input, shape index: {}]   ;;  %s2906_s3 = inlined_call_operand.hbm [shape: bf16[3,32,32], index: 3, kind: input, shape index: {}]   ;;  %s2907_s4 = inlined_call_operand.hbm [shape: bf16[3,32,32], index: 4, kind: input, shape index: {}]   ;;  %s2908_s5 = inlined_call_operand.vmem [shape: f32[1,32], index: 5, kind: input, shape index: {}]   ;;  %s2909_s6 = inlined_call_operand.vmem [shape: f32[1,32], index: 6, kind: input, shape index: {}]   ;;  %s2910_s7 = inlined_call_operand.hbm [shape: bf16[8,32,32], index: 7, kind: output, shape index: {}]  }
   0x1   :  { %14 = vsyncpa [#allocation6 + $0x1], 0 }
   0x2   :  { %15 = vsyncpa [#allocation9], 0 }
   0x3   :  { %16 = vsyncpa [#allocation7], 0 }
   0x4   :  { %18 = vsyncpa [#allocation7 + $0x1], 0  ;;  %s2404_s24 = smov 0   ;;  %s2406_s25 = smov 0  }
   0x5   :  { %s2408_s26 = smov 0   ;;  %s2410_s27 = smov 0  }
   0x6 LB: > { %s2425_s28 = sadd.s32 4294967295, %s2351_s27   ;;  %s1702_s29 = sadd.s32 4294967294, %s2351_s27   ;;  %s2351_s27 = sphi %s2410_s27, %s2938_s27   ;;  %s2347_s26 = sphi %s2408_s26, %s2942_s26   ;;  %s2343_s25 = sphi %s2406_s25, %s2941_s25   ;;  %s2339_s24 = sphi %s2404_s24, %s2940_s24  }
   0x7   : > { %s2429_s30 = sadd.s32 1, %s2351_s27   ;;  %s31_s8 = sadd.s32 1, %s2347_s26 }
   0x8   : > { %2919 = sst [smem:[#allocation15_spill]] %s2429_s30  ;;  %s28_s9 = ssub.s32 %s2351_s27, %s2429_s30 }
   0x9   : > { %p38_p0 = scmp.ne.s32.totalorder %s2347_s26, %s2343_s25  ;;  %p29_p1 = scmp.eq.s32.totalorder %s28_s9, 0 }
   0xa   : > { %p39_p2 = scmp.eq.s32.totalorder %s2351_s27, 0  ;;  %p44_p3 = scmp.ne.s32.totalorder %s2343_s25, %s2339_s24 }
   0xb   : > { %p2911_p4 = scmp.eq.s32.totalorder %s2425_s28, 0  ;;  %p194_p7 = scmp.eq.s32.totalorder %s2425_s28, 3 }
   0xc   : > { %s2441_s10 = scalar_select %p29_p1, %s2347_s26, %s31_s8  }
   0xd   : > { %p2443_p5 = por %p39_p2, %p38_p0  ;;  %p2449_p6 = por %p2911_p4, %p44_p3 }
   0xe   : > { %2920 = sst [smem:[#allocation16_spill]] %s2441_s10  ;;  %p200_p8 = scmp.eq.s32.totalorder %s1702_s29, 3 }
   0xf   : > { %s2921_s11 = scalar_select %p2443_p5, 1, 0 }
  0x10   : > { %s2922_s12 = scalar_select %p2449_p6, 1, 0 }
  0x11   : > { %p1703_p9 = scmp.ge.s32.totalorder %s2351_s27, 1  ;;  %p207_p10 = scmp.lt.s32.totalorder %s2351_s27, 5 }
  0x12   : > { %p2456_p11 = por %p194_p7, %p38_p0  ;;  %p2460_p12 = por %p200_p8, %p44_p3 }
  0x13   : > { %p2464_p13 = pnand %p1703_p9, %p207_p10  ;;  %s2353_s16 = smov [#allocation8]  }
  0x14   : > { %s2923_s13 = scalar_select %p2456_p11, 1, 0 }
  0x15   : > { %s2924_s14 = scalar_select %p2460_p12, 1, 0 }
  0x16   : > { %s2925_s15 = scalar_select %p2464_p13, 1, 0 }
  0x17   : > { %p2085_p1 = pneg %p2464_p13  ;;  %s225_s17 = sshll.u32 %s2353_s16, 4  ;;  %s226_s17 = int_to_ptr.vmem [resolvable:$true] %s225_s17 }
  0x18   : > { %s2354_s19 = smov [#allocation10]   ;;  %s2195_s23 = scalar_lea.hbm %s2906_s3, 768 }
  0x19   : > { %p2472_p2 = pnand %p2085_p1, %p2911_p4  ;;  %s238_s20 = sshll.u32 %s2354_s19, 4  ;;  %s239_s20 = int_to_ptr.vmem [resolvable:$true] %s238_s20 }
  0x1a   : > { %p2196_p3 = scmp.ne.s32.totalorder %s2906_s3, %s2195_s23  ;;  %p2202_p10 = scmp.lt.u32.totalorder %s2195_s23, %s2906_s3 }
  0x1b   : > { %p2197_p7 = pneg %p2472_p2 }
  0x1d   : > { %p2198_p8 = pnand %p2197_p7, %p2196_p3 }
  0x1f   : > { %p2199_p9 = pneg %p2198_p8 }
  0x21   : > { %p2204_p1 = pnand %p2202_p10, %p2199_p9 }
  0x23   : > { %2207 = shalt.err (!%p2204_p1)
}
  0x24   : > { %s2208_s19 = scalar_lea.vmem %s226_s17, 768  ;;  %p2216_p11 = scmp.lt.s32.totalorder %s226_s17, %s226_s17 }
  0x25   : > { %p2209_p4 = scmp.ne.s32.totalorder %s226_s17, %s2208_s19  ;;  %p2217_p6 = scmp.lt.s32.totalorder %s2208_s19, %s2208_s19 }
  0x27   : > { %p2211_p0 = pnand %p2209_p4, %p2197_p7  ;;  %p2218_p13 = por %p2217_p6, %p2216_p11 }
  0x29   : > { %p2212_p12 = pneg %p2211_p0 }
  0x2b   : > { %p2219_p5 = pnand %p2218_p13, %p2212_p12 }
  0x2d   : > { %2222 = shalt.err (!%p2219_p5)
}
  0x2e   : > { %s2918_s21 = smov 64   ;;  %s2356_s22 = smov 4  }
  0x2f   : > { %2088 = dma.hbm_to_vmem [thread:$0]  (!%p2472_p2), %s2906_s3, 768, %s226_s17, [#allocation9], %s2918_s21, %s2918_s21, %s2356_s22  }
  0x30   : > { %p2927_p4 = scmp.ne.s32.totalorder %s2921_s11, 0  ;;  %p2928_p0 = scmp.lt.s32.totalorder %s2351_s27, 4 }
  0x31   : > { %s2223_s19 = scalar_lea.hbm %s2907_s4, 768 }
  0x32   : > { %p2506_p3 = pnand %p2928_p0, %p2927_p4  ;;  %p2224_p5 = scmp.ne.s32.totalorder %s2907_s4, %s2223_s19 }
  0x33   : > { %p2230_p12 = scmp.lt.u32.totalorder %s2223_s19, %s2907_s4 }
  0x34   : > { %s2929_s8 = scalar_select %p2506_p3, 1, 0 }
  0x35   : > { %p2226_p6 = pnand %p2224_p5, %p2197_p7 }
  0x37   : > { %p2227_p11 = pneg %p2226_p6 }
  0x39   : > { %p2232_p13 = pnand %p2230_p12, %p2227_p11 }
  0x3b   : > { %2235 = shalt.err (!%p2232_p13)
}
  0x3c   : > { %s2236_s23 = scalar_lea.vmem %s239_s20, 768  ;;  %p2244_p1 = scmp.lt.s32.totalorder %s239_s20, %s239_s20 }
  0x3d   : > { %p2237_p8 = scmp.ne.s32.totalorder %s239_s20, %s2236_s23  ;;  %p2245_p4 = scmp.lt.s32.totalorder %s2236_s23, %s2236_s23 }
  0x3f   : > { %p2239_p9 = pnand %p2237_p8, %p2197_p7  ;;  %p2246_p0 = por %p2245_p4, %p2244_p1 }
  0x41   : > { %p2240_p10 = pneg %p2239_p9 }
  0x43   : > { %p2247_p3 = pnand %p2246_p0, %p2240_p10 }
  0x45   : > { %2250 = shalt.err (!%p2247_p3)
}
  0x46   : > { %2091 = dma.hbm_to_vmem [thread:$0]  (!%p2472_p2), %s2907_s4, 768, %s239_s20, [#allocation9], %s2918_s21, %s2918_s21, %s2356_s22  }
  0x47   : > { %s258_s29 = sand.u32 1, %s2347_s26   ;;  %s1708_s16 = sshll.u32 %s2351_s27, 6 }
  0x48   : > { %s1707_s9 = sshll.u32 %s258_s29, 6  ;;  %s2538_s11 = scalar_lea.hbm %s2903_s0, %s1708_s16 }
  0x49   : > { %s262_s18 = scalar_lea.vmem [#allocation5], %s1707_s9  ;;  %s2542_s30 = scalar_lea.sflag [#allocation6], %s258_s29 }
  0x4a   : > { %s268_s23 = sshll.u32 %s262_s18, 4  ;;  %s2251_s10 = scalar_lea.hbm %s2538_s11, 1024  ;;  %s2540_s23 = int_to_ptr.vmem [resolvable:$true] %s268_s23 }
  0x4b   : > { %p2252_p2 = scmp.ne.s32.totalorder %s2538_s11, %s2251_s10  ;;  %p2930_p7 = scmp.ne.s32.totalorder %s2929_s8, 0 }
  0x4c   : > { %s2256_s19 = scalar_lea.hbm %s2903_s0, 4096  ;;  %p2257_p11 = scmp.lt.u32.totalorder %s2538_s11, %s2903_s0 }
  0x4d   : > { %p2253_p3 = pneg %p2930_p7  ;;  %p2258_p12 = scmp.lt.u32.totalorder %s2256_s19, %s2251_s10 }
  0x4e   : > { %p2260_p8 = scmp.lt.u32.totalorder %s2251_s10, %s2538_s11 }
  0x4f   : > { %p2254_p5 = pnand %p2253_p3, %p2252_p2  ;;  %p2259_p13 = por %p2258_p12, %p2257_p11 }
  0x51   : > { %p2255_p6 = pneg %p2254_p5  ;;  %p2261_p9 = por %p2260_p8, %p2259_p13 }
  0x53   : > { %p2262_p10 = pnand %p2261_p9, %p2255_p6 }
  0x55   : > { %2265 = shalt.err (!%p2262_p10)
}
  0x56   : > { %s2266_s29 = scalar_lea.vmem %s2540_s23, 1024  ;;  %s2357_s9 = smov [#allocation5]  }
  0x57   : > { %p2267_p1 = scmp.ne.s32.totalorder %s2540_s23, %s2266_s29  ;;  %s2271_s18 = sshll.u32 %s2357_s9, 4  ;;  %s2272_s18 = int_to_ptr.vmem [resolvable:$false] %s2271_s18 }
  0x58   : > { %s2273_s21 = scalar_lea.vmem %s2272_s18, 2048  ;;  %p2274_p2 = scmp.lt.s32.totalorder %s2540_s23, %s2272_s18 }
  0x59   : > { %p2269_p4 = pnand %p2267_p1, %p2253_p3  ;;  %p2275_p5 = scmp.lt.s32.totalorder %s2273_s21, %s2266_s29 }
  0x5b   : > { %p2270_p0 = pneg %p2269_p4  ;;  %p2276_p11 = por %p2275_p5, %p2274_p2 }
  0x5d   : > { %p2277_p12 = pnand %p2276_p11, %p2270_p0 }
  0x5f   : > { %2280 = shalt.err (!%p2277_p12)
}
  0x60   : > { %s2358_s10 = smov 256   ;;  %s2931_s20 = smov 64  }
  0x61   : > { %2095 = dma.hbm_to_vmem [thread:$0]  (!%p2930_p7), %s2538_s11, 1024, %s2540_s23, %s2542_s30, %s2358_s10, %s2931_s20, %s2356_s22  }
  0x62   : > { %p2932_p3 = scmp.ne.s32.totalorder %s2925_s15, 0 }
  0x63   : > { %s2575_s16 = sand.u32 (!%p2932_p3), 1, %s2343_s25   ;;  %p2933_p6 = scmp.ne.s32.totalorder (!%p2932_p3), %s2922_s12, 0 }
  0x64   : > { %280 = sbr.rel (%p2932_p3) target bundleno = 699 (0x2bb), region = 48  ;;  %s1710_s19 = sshll.u32 (!%p2932_p3), %s2575_s16, 6 }
  0x65   : > { %s283_s17 = scalar_lea.sflag (!%p2932_p3), [#allocation6], %s2575_s16  ;;  %s2579_s29 = scalar_lea.vmem (!%p2932_p3), [#allocation5], %s1710_s19 }
  0x6b   : > { %2326 = dma.done.wait (%p2933_p6), %s283_s17, 1024  }
  0x6c   : > { %2328 = vsyncadd (%p2933_p6), %s283_s17, 4294966272  ;;  %p2934_p7 = scmp.eq.s32.totalorder %s2425_s28, 0 }
  0x6e   : > { %2330 = dma.done.wait (%p2934_p7), [#allocation9], 1536   ;;  %p2935_p13 = pmov %p2934_p7 }
  0x6f   : > { %vm326_vm0 = vcmask 257024   ;;  %v2359_v0 = vmov 0   ;;  %v2147_v1 = vld [vmem:[#allocation8 + $0x10] sm:$0xff]   ;;  %v2148_v2 = vld [vmem:[#allocation8 + $0x18] sm:$0xff]   ;;  %v1839_v3 = vld [vmem:[%s2579_s29] sm:$0xff]   ;;  %vm559_vm1 = vcmask 261120  }
  0x70   : > { %2332 = vsyncadd (%p2935_p13), [#allocation9], 4294965760  ;;  %327 = vst.msk [vmem:[#allocation2] sm:$0xf] %vm326_vm0, %v2359_v0  ;;  %1925 = vmatprep.subr.bf16.mxu0 %v2147_v1  ;;  %v2596_v4 = vld [vmem:[%s2904_s1] ss:$0 sm:$0xff]  ;;  %2021 = vmatprep.subr.bf16.mxu1 %v2147_v1  ;;  %v1840_v6 = vunpack.c.l.bf16 %v1839_v3  ;;  %v1841_v7 = vunpack.c.h.bf16 %v1839_v3 }
  0x71   : > { %329 = vst.msk [vmem:[#allocation2 + $0x44] sm:$0xf] %vm326_vm0, %v2359_v0  ;;  %330 = vst.msk [vmem:[#allocation4] sm:$0xf] %vm326_vm0, %v2359_v0  ;;  %v2601_v5 = vld [vmem:[%s2905_s2] ss:$0 sm:$0xff]  ;;  %1926 = vmatpush3.bf16.msra.mxu0 %v2147_v1  ;;  %2023 = vmatpush3.bf16.msra.mxu1 %v2147_v1 }
  0x72   : > { %v2603_v8 = vld [vmem:[#allocation8] sm:$0xff]   ;;  %1927 = vmatprep.subr.bf16.mxu0 %v2148_v2  ;;  %v1870_v9 = vld [vmem:[%s2579_s29 + $0x8] sm:$0xff]   ;;  %2022 = vmatprep.subr.bf16.mxu1 %v2148_v2  ;;  %v370_v10 = vmul.f32 %v1840_v6, %v2596_v4  ;;  %v371_v11 = vmul.f32 %v1841_v7, %v2596_v4  ;;  %v1871_v14 = vld [vmem:[%s2579_s29 + $0x10] sm:$0xff]   ;;  %s1713_s18 = sshll.u32 %s2575_s16, 5  ;;  %s1819_s20 = sshll.u32 %s2425_s28, 6 }
  0x73   : > { %v1844_v12 = vunpack.c.l.bf16 %v1870_v9  ;;  %v1845_v13 = vunpack.c.h.bf16 %v1870_v9  ;;  %v1872_v19 = vld [vmem:[%s2579_s29 + $0x18] sm:$0xff]   ;;  %v1873_v20 = vld [vmem:[%s2579_s29 + $0x20] sm:$0xff]   ;;  %v1848_v21 = vunpack.c.l.bf16 %v1871_v14  ;;  %v1849_v22 = vunpack.c.h.bf16 %v1871_v14  ;;  %v1874_v33 = vld [vmem:[%s2579_s29 + $0x28] sm:$0xff]   ;;  %s2827_s21 = scalar_lea.vmem [#allocation11], %s1713_s18  ;;  %s1598_s28 = scalar_lea.sflag [#allocation7], %s2575_s16 }
  0x74   : > { %v393_v15 = vadd.f32 %v2601_v5, %v370_v10  ;;  %v394_v16 = vadd.f32 %v2601_v5, %v371_v11  ;;  %v1852_v23 = vunpack.c.l.bf16 %v1872_v19  ;;  %v1853_v24 = vunpack.c.h.bf16 %v1872_v19  ;;  %v1875_v50 = vld [vmem:[%s2579_s29 + $0x30] sm:$0xff]   ;;  %v1876_v55 = vld [vmem:[%s2579_s29 + $0x38] sm:$0xff]   ;;  %s1610_s10 = sshll.u32 %s2827_s21, 4  ;;  %s2854_s29 = scalar_lea.hbm %s2910_s7, %s1819_s20  ;;  %s2847_s10 = int_to_ptr.vmem [resolvable:$true] %s1610_s10 }
  0x75   : > { %1928 = vmatpush3.bf16.msra.mxu0 %v2148_v2  ;;  %v372_v17 = vmul.f32 %v1844_v12, %v2596_v4  ;;  %v373_v18 = vmul.f32 %v1845_v13, %v2596_v4  ;;  %2024 = vmatpush3.bf16.msra.mxu1 %v2148_v2  ;;  %v374_v29 = vmul.f32 %v1848_v21, %v2596_v4  ;;  %v1856_v32 = vunpack.c.l.bf16 %v1873_v20  ;;  %v2152_v12 = vld [vmem:[#allocation8 + $0x8] sm:$0xff]   ;;  %s2281_s12 = scalar_lea.vmem %s2847_s10, 512  ;;  %p2936_p9 = scmp.ne.s32.totalorder %s2923_s13, 0 }
  0x76   : > { %1945 = vmatprep.subr.bf16.mxu0 %v2603_v8  ;;  %v2616_v25 = vmax.f32 %v393_v15, 0.0  ;;  %v2618_v26 = vmax.f32 %v394_v16, 0.0  ;;  %v375_v30 = vmul.f32 %v1849_v22, %v2596_v4  ;;  %v376_v31 = vmul.f32 %v1852_v23, %v2596_v4  ;;  %p2282_p8 = scmp.ne.s32.totalorder %s2847_s10, %s2281_s12  ;;  %s2360_s15 = smov [#allocation11]  }
  0x77   : > { %v395_v27 = vadd.f32 %v2601_v5, %v372_v17  ;;  %v396_v28 = vadd.f32 %v2601_v5, %v373_v18  ;;  %v397_v38 = vadd.f32 %v2601_v5, %v374_v29  ;;  %v377_v41 = vmul.f32 %v1853_v24, %v2596_v4  ;;  %s2285_s22 = sshll.u32 %s2360_s15, 4  ;;  %s2286_s22 = int_to_ptr.vmem [resolvable:$false] %s2285_s22 }
  0x78   : > { %v433_v34 = vpack.c.bf16 %v2616_v25, %v2616_v25  ;;  %v434_v35 = vpack.c.bf16 %v2618_v26, %v2618_v26  ;;  %v398_v39 = vadd.f32 %v2601_v5, %v375_v30  ;;  %v399_v40 = vadd.f32 %v2601_v5, %v376_v31  ;;  %p2283_p10 = pnand %p2282_p8, %p2936_p9  ;;  %s2287_s8 = scalar_lea.vmem %s2286_s22, 1024 }
  0x79   : > { %v2630_v36 = vmax.f32 %v395_v27, 0.0  ;;  %v2632_v37 = vmax.f32 %v396_v28, 0.0  ;;  %v378_v44 = vmul.f32 %v1856_v32, %v2596_v4  ;;  %v1857_v45 = vunpack.c.h.bf16 %v1873_v20  ;;  %p2288_p4 = scmp.lt.s32.totalorder %s2847_s10, %s2286_s22  ;;  %p2289_p0 = scmp.lt.s32.totalorder %s2287_s8, %s2281_s12 }
  0x7a   : > { %450 = vst.msk [vmem:[#allocation2 + $0x4] sm:$0xf] %vm326_vm0, %v433_v34  ;;  %451 = vst.msk [vmem:[#allocation2 + $0x8] sm:$0xf] %vm326_vm0, %v434_v35  ;;  %v2645_v46 = vmax.f32 %v397_v38, 0.0  ;;  %v2647_v47 = vmax.f32 %v398_v39, 0.0  ;;  %v400_v49 = vadd.f32 %v2601_v5, %v377_v41  ;;  %v1860_v52 = vunpack.c.l.bf16 %v1874_v33  ;;  %p2284_p1 = pneg %p2283_p10 }
  0x7b   : > { %v435_v42 = vpack.c.bf16 %v2630_v36, %v2630_v36  ;;  %v436_v43 = vpack.c.bf16 %v2632_v37, %v2632_v37  ;;  %v2649_v48 = vmax.f32 %v399_v40, 0.0  ;;  %v401_v51 = vadd.f32 %v2601_v5, %v378_v44  ;;  %v2154_v34 = vld [vmem:[#allocation8 + $0x20] sm:$0xff]   ;;  %p2290_p2 = por %p2289_p0, %p2288_p4 }
  0x7c   : > { %v379_v53 = vmul.f32 %v1857_v45, %v2596_v4  ;;  %v1861_v54 = vunpack.c.h.bf16 %v1874_v33  ;;  %v437_v56 = vpack.c.bf16 %v2645_v46, %v2645_v46  ;;  %v438_v57 = vpack.c.bf16 %v2647_v47, %v2647_v47 }
  0x7d   : > { %452 = vst.msk [vmem:[#allocation2 + $0xc] sm:$0xf] %vm326_vm0, %v435_v42  ;;  %453 = vst.msk [vmem:[#allocation2 + $0x10] sm:$0xf] %vm326_vm0, %v436_v43  ;;  %v439_v58 = vpack.c.bf16 %v2649_v48, %v2649_v48  ;;  %v2664_v59 = vmax.f32 %v400_v49, 0.0  ;;  %v2666_v60 = vmax.f32 %v401_v51, 0.0  ;;  %v380_v61 = vmul.f32 %v1860_v52, %v2596_v4  ;;  %p2291_p5 = pnand %p2290_p2, %p2284_p1 }
  0x7e   : > { %v402_v62 = vadd.f32 %v2601_v5, %v379_v53  ;;  %v1864_v63 = vunpack.c.l.bf16 %v1875_v50  ;;  %454 = vst.msk [vmem:[#allocation2 + $0x14] sm:$0xf] %vm326_vm0, %v437_v56  ;;  %455 = vst.msk [vmem:[#allocation2 + $0x18] sm:$0xf] %vm326_vm0, %v438_v57  ;;  %v381_v1 = vmul.f32 %v1861_v54, %v2596_v4  ;;  %v1865_v2 = vunpack.c.h.bf16 %v1875_v50  ;;  %v2159_v43 = vld [vmem:[#allocation8 + $0x28] sm:$0xff]  }
  0x7f   : > { %456 = vst.msk [vmem:[#allocation2 + $0x1c] sm:$0xf] %vm326_vm0, %v439_v58  ;;  %v440_v0 = vpack.c.bf16 %v2664_v59, %v2664_v59  ;;  %v1868_v3 = vunpack.c.l.bf16 %v1876_v55  ;;  %v441_v6 = vpack.c.bf16 %v2666_v60, %v2666_v60  ;;  %v403_v7 = vadd.f32 %v2601_v5, %v380_v61 }
  0x80   : > { %v2679_v9 = vmax.f32 %v402_v62, 0.0  ;;  %v382_v10 = vmul.f32 %v1864_v63, %v2596_v4  ;;  %v404_v13 = vadd.f32 %v2601_v5, %v381_v1  ;;  %v383_v14 = vmul.f32 %v1865_v2, %v2596_v4  ;;  %v2177_v2 = vld [vmem:[#allocation10 + $0x10] sm:$0xff]  }
  0x81   : > { %v2149_v11 = vld [vmem:[#allocation2 + $0x4] sm:$0xff]   ;;  %457 = vst.msk [vmem:[#allocation2 + $0x20] sm:$0xf] %vm326_vm0, %v440_v0  ;;  %v384_v15 = vmul.f32 %v1868_v3, %v2596_v4  ;;  %v1869_v16 = vunpack.c.h.bf16 %v1876_v55  ;;  %458 = vst.msk [vmem:[#allocation2 + $0x24] sm:$0xf] %vm326_vm0, %v441_v6  ;;  %v2687_v18 = vmax.f32 %v403_v7, 0.0  ;;  %1985 = vmatprep.subr.bf16.mxu1 %v2177_v2 }
  0x82   : > { %v2153_v17 = vld [vmem:[#allocation2] sm:$0xff]   ;;  %v442_v19 = vpack.c.bf16 %v2679_v9, %v2679_v9  ;;  %v405_v20 = vadd.f32 %v2601_v5, %v382_v10  ;;  %1929 = vmatprep.mubr.msk.bf16.mxu0 %vm559_vm1, %v2149_v11  ;;  %v2693_v22 = vmax.f32 %v404_v13, 0.0  ;;  %v406_v23 = vadd.f32 %v2601_v5, %v383_v14  ;;  %v2179_v3 = vld [vmem:[#allocation10 + $0x18] sm:$0xff]  }
  0x83   : > { %v407_v24 = vadd.f32 %v2601_v5, %v384_v15  ;;  %v385_v27 = vmul.f32 %v1869_v16, %v2596_v4  ;;  %v443_v28 = vpack.c.bf16 %v2687_v18, %v2687_v18  ;;  %v2750_v6 = vld [vmem:[#allocation10] sm:$0xff]  }
  0x84   : > { %v2151_v21 = vld [vmem:[#allocation2 + $0xc] sm:$0xff]   ;;  %459 = vst.msk [vmem:[#allocation2 + $0x28] sm:$0xf] %vm326_vm0, %v442_v19  ;;  %v2701_v29 = vmax.f32 %v405_v20, 0.0  ;;  %v444_v30 = vpack.c.bf16 %v2693_v22, %v2693_v22  ;;  %v2706_v31 = vmax.f32 %v406_v23, 0.0 }
  0x85   : > { %1930 = vmatmul.mubr.msk.bf16.vlgmr.msra.gmra.mrb[0].mxu0 %vm559_vm1, %v2151_v21  ;;  %v2708_v32 = vmax.f32 %v407_v24, 0.0  ;;  %v408_v33 = vadd.f32 %v2601_v5, %v385_v27  ;;  %460 = vst.msk [vmem:[#allocation2 + $0x2c] sm:$0xf] %vm326_vm0, %v443_v28  ;;  %v2165_v39 = vld [vmem:[#allocation2 + $0x14] sm:$0xff]   ;;  %v2155_v41 = vld [vmem:[#allocation2 + $0x8] sm:$0xff]  }
  0x86   : > { %1946 = vmatpush3.bf16.msra.mxu0 %v2603_v8  ;;  %1949 = vmatprep.mubr.msk.bf16.mxu0 %vm559_vm1, %v2153_v17  ;;  %v445_v4 = vpack.c.bf16 %v2701_v29, %v2701_v29  ;;  %461 = vst.msk [vmem:[#allocation2 + $0x30] sm:$0xf] %vm326_vm0, %v444_v30  ;;  %v446_v35 = vpack.c.bf16 %v2706_v31, %v2706_v31  ;;  %v2156_v42 = vld [vmem:[#allocation2 + $0x10] sm:$0xff]   ;;  %v2157_v49 = vld [vmem:[#allocation2 + $0x18] sm:$0xff]   ;;  %v2163_v56 = vld [vmem:[#allocation2 + $0x8] sm:$0xff]  }
  0x87   : > { %1947 = vmatprep.subr.bf16.mxu0 %v2152_v12  ;;  %v447_v38 = vpack.c.bf16 %v2708_v32, %v2708_v32  ;;  %v2721_v5 = vmax.f32 %v408_v33, 0.0  ;;  %1933 = vmatprep.mubr.msk.bf16.mxu1 %vm559_vm1, %v2165_v39  ;;  %v2164_v57 = vld [vmem:[#allocation2 + $0x10] sm:$0xff]   ;;  %v2167_v58 = vld [vmem:[#allocation2 + $0x18] sm:$0xff]   ;;  %v2764_v23 = vld [vmem:[%s2908_s5] ss:$0 sm:$0xff] }
  0x88   : > { %462 = vst.msk [vmem:[#allocation2 + $0x34] sm:$0xf] %vm326_vm0, %v445_v4  ;;  %463 = vst.msk [vmem:[#allocation2 + $0x38] sm:$0xf] %vm326_vm0, %v446_v35  ;;  %v2166_v40 = vld [vmem:[#allocation2 + $0x1c] sm:$0xff]  }
  0x89   : > { %464 = vst.msk [vmem:[#allocation2 + $0x3c] sm:$0xf] %vm326_vm0, %v447_v38  ;;  %v448_v8 = vpack.c.bf16 %v2721_v5, %v2721_v5  ;;  %1934 = vmatmul.mubr.msk.bf16.vlgmr.msra.gmra.mrb[0].mxu1 %vm559_vm1, %v2166_v40  ;;  %v2158_v51 = vld [vmem:[#allocation2 + $0x20] sm:$0xff]  }
  0x8a   : > { %1948 = vmatpush3.bf16.msra.mxu0 %v2152_v12  ;;  %v2168_v61 = vld [vmem:[#allocation2 + $0x20] sm:$0xff]   ;;  %1986 = vmatpush3.bf16.msra.mxu1 %v2177_v2 }
  0x8b   : > { %1965 = vmatprep.subr.bf16.mxu0 %v2154_v34  ;;  %465 = vst.msk [vmem:[#allocation2 + $0x40] sm:$0xf] %vm326_vm0, %v448_v8  ;;  %v2169_v44 = vld [vmem:[#allocation2 + $0x24] sm:$0xff]   ;;  %1987 = vmatprep.subr.bf16.mxu1 %v2179_v3 }
  0x8c   : > { %1937 = vmatprep.mubr.msk.bf16.mxu1 %vm559_vm1, %v2169_v44  ;;  %v2160_v53 = vld [vmem:[#allocation2 + $0x28] sm:$0xff]  }
  0x8d   : > { %v2170_v45 = vld [vmem:[#allocation2 + $0x2c] sm:$0xff]  }
  0x8e   : > { %v2171_v62 = vld [vmem:[#allocation2 + $0x28] sm:$0xff]   ;;  %1988 = vmatpush3.bf16.msra.mxu1 %v2179_v3 }
  0x8f   : > { %v2173_v50 = vld [vmem:[#allocation2 + $0x34] sm:$0xff]   ;;  %1997 = vmatprep.subr.bf16.mxu1 %v2750_v6 }
  0x90   : > { %v2161_v54 = vld [vmem:[#allocation2 + $0x30] sm:$0xff]   ;;  %v2162_v55 = vld [vmem:[#allocation2 + $0x38] sm:$0xff]  }
  0x91   : > { %1950 = vmatmul.mubr.msk.bf16.vlgmr.msra.gmra.mrb[0].mxu0 %vm559_vm1, %v2155_v41  ;;  %1938 = vmatmul.mubr.msk.bf16.gmra.mrb[4].mxu1 %vm559_vm1, %v2170_v45  ;;  %v2172_v63 = vld [vmem:[#allocation2 + $0x30] sm:$0xff]   ;;  %v2175_v0 = vld [vmem:[#allocation2 + $0x38] sm:$0xff]  }
  0x92   : > { %1966 = vmatpush3.bf16.msra.mxu0 %v2154_v34  ;;  %1953 = vmatprep.mubr.msk.bf16.mxu0 %vm559_vm1, %v2156_v42  ;;  %v2174_v52 = vld [vmem:[#allocation2 + $0x3c] sm:$0xff]  }
  0x93   : > { %1967 = vmatprep.subr.bf16.mxu0 %v2159_v43  ;;  %1941 = vmatprep.mubr.msk.bf16.mxu1 %vm559_vm1, %v2173_v50  ;;  %v2176_v1 = vld [vmem:[#allocation2 + $0x40] sm:$0xff]  }
  0x96   : > { %1968 = vmatpush3.bf16.msra.mxu0 %v2159_v43 }
  0x99   : > { %1954 = vmatmul.mubr.msk.bf16.gmra.mrb[4].mxu0 %vm559_vm1, %v2157_v49  ;;  %1942 = vmatmul.mubr.msk.bf16.gmra.mrb[8].mxu1 %vm559_vm1, %v2174_v52 }
  0x9a   : > { %1957 = vmatprep.mubr.msk.bf16.mxu0 %vm559_vm1, %v2158_v51 }
  0xa1   : > { %1958 = vmatmul.mubr.msk.bf16.gmra.mrb[8].mxu0 %vm559_vm1, %v2160_v53 }
  0xa2   : > { %1961 = vmatprep.mubr.msk.bf16.mxu0 %vm559_vm1, %v2161_v54 }
  0xa9   : > { %1962 = vmatmul.mubr.msk.bf16.gmra.mrb[12].mxu0 %vm559_vm1, %v2162_v55 }
  0xaa   : > { %1969 = vmatprep.mubr.msk.bf16.mxu0 %vm559_vm1, %v2163_v56 }
  0xb1   : > { %1970 = vmatmul.mubr.msk.bf16.vlgmr.msra.gmra.mrb[0].mxu0 %vm559_vm1, %v2164_v57 }
  0xb2   : > { %1973 = vmatprep.mubr.msk.bf16.mxu0 %vm559_vm1, %v2167_v58 }
  0xb9   : > { %1974 = vmatmul.mubr.msk.bf16.gmra.mrb[4].mxu0 %vm559_vm1, %v2168_v61 }
  0xba   : > { %1977 = vmatprep.mubr.msk.bf16.mxu0 %vm559_vm1, %v2171_v62 }
  0xc1   : > { %1978 = vmatmul.mubr.msk.bf16.gmra.mrb[8].mxu0 %vm559_vm1, %v2172_v63 }
  0xc2   : > { %1981 = vmatprep.mubr.msk.bf16.mxu0 %vm559_vm1, %v2175_v0 }
  0xc9   : > { %1982 = vmatmul.mubr.msk.bf16.gmra.mrb[12].mxu0 %vm559_vm1, %v2176_v1 }
 0x15c   : > { %v1935_v7 = vpop.f32.mrb[0].mxu1 }
 0x15d   : > { %v634_v10 = vpop.f32.mrb[1].mxu1 }
 0x15e   : > { %v1936_v11 = vpop.f32.mrb[2].mxu1 }
 0x15f   : > { %v637_v12 = vpop.f32.mrb[3].mxu1 }
 0x164   : > { %v1939_v13 = vpop.f32.mrb[4].mxu1 }
 0x165   : > { %v650_v14 = vpop.f32.mrb[5].mxu1 }
 0x166   : > { %v1940_v15 = vpop.f32.mrb[6].mxu1 }
 0x167   : > { %v653_v16 = vpop.f32.mrb[7].mxu1 }
 0x16c   : > { %v2753_v17 = vpop.f32.mrb[8].mxu1 }
 0x16d   : > { %v2755_v19 = vpop.f32.mrb[9].mxu1 }
 0x16e   : > { %v2757_v20 = vpop.f32.mrb[10].mxu1 }
 0x16f   : > { %v2759_v21 = vpop.f32.mrb[11].mxu1 }
 0x184   : > { %v1971_v24 = vpop.f32.mrb[0].mxu0 }
 0x185   : > { %v1074_v27 = vadd.f32 %v1971_v24, %v2764_v23  ;;  %v986_v28 = vpop.f32.mrb[1].mxu0 }
 0x186   : > { %v1072_v30 = vadd.f32 %v2764_v23, %v986_v28  ;;  %v1972_v33 = vpop.f32.mrb[2].mxu0 }
 0x187   : > { %v1090_v4 = vmax.f32 %v1074_v27, 0.0  ;;  %v1075_v34 = vadd.f32 %v1972_v33, %v2764_v23  ;;  %v989_v35 = vpop.f32.mrb[3].mxu0 }
 0x188   : > { %v1088_v38 = vmax.f32 %v1072_v30, 0.0  ;;  %v1073_v8 = vadd.f32 %v2764_v23, %v989_v35 }
 0x189   : > { %v1824_v39 = vpack.c.bf16 %v1090_v4, %v1090_v4  ;;  %v1091_v40 = vmax.f32 %v1075_v34, 0.0 }
 0x18a   : > { %v1822_v41 = vpack.c.bf16 %v1088_v38, %v1088_v38  ;;  %v1089_v42 = vmax.f32 %v1073_v8, 0.0 }
 0x18b   : > { %1169 = vst.msk [vmem:[#allocation3 + $0x4] sm:$0xf] %vm326_vm0, %v1824_v39  ;;  %v1825_v43 = vpack.c.bf16 %v1091_v40, %v1091_v40 }
 0x18c   : > { %1168 = vst.msk [vmem:[#allocation3] sm:$0xf] %vm326_vm0, %v1822_v41  ;;  %v1823_v44 = vpack.c.bf16 %v1089_v42, %v1089_v42  ;;  %v1975_v45 = vpop.f32.mrb[4].mxu0 }
 0x18d   : > { %1178 = vst.msk [vmem:[#allocation4 + $0x8] sm:$0xf] %vm326_vm0, %v1825_v43  ;;  %v2025_v49 = vadd.f32 %v1975_v45, %v1935_v7  ;;  %v1002_v50 = vpop.f32.mrb[5].mxu0 }
 0x18e   : > { %1177 = vst.msk [vmem:[#allocation4 + $0x4] sm:$0xf] %vm326_vm0, %v1823_v44  ;;  %v2026_v51 = vadd.f32 %v1002_v50, %v634_v10  ;;  %v1976_v52 = vpop.f32.mrb[6].mxu0 }
 0x18f   : > { %v1078_v53 = vadd.f32 %v2025_v49, %v2764_v23  ;;  %v2027_v54 = vadd.f32 %v1976_v52, %v1936_v11  ;;  %v1005_v55 = vpop.f32.mrb[7].mxu0 }
 0x190   : > { %v1076_v56 = vadd.f32 %v2026_v51, %v2764_v23  ;;  %v2028_v57 = vadd.f32 %v1005_v55, %v637_v12  ;;  %v2183_v51 = vld [vmem:[#allocation10 + $0x8] sm:$0xff]  }
 0x191   : > { %v1094_v58 = vmax.f32 %v1078_v53, 0.0  ;;  %v1079_v61 = vadd.f32 %v2027_v54, %v2764_v23 }
 0x192   : > { %v1092_v62 = vmax.f32 %v1076_v56, 0.0  ;;  %v1077_v63 = vadd.f32 %v2028_v57, %v2764_v23 }
 0x193   : > { %v1828_v0 = vpack.c.bf16 %v1094_v58, %v1094_v58  ;;  %v1095_v1 = vmax.f32 %v1079_v61, 0.0  ;;  %v2178_v2 = vld [vmem:[#allocation3] sm:$0xff]   ;;  %v2186_v61 = vld [vmem:[#allocation10 + $0x20] sm:$0xff]  }
 0x194   : > { %v1826_v3 = vpack.c.bf16 %v1092_v62, %v1092_v62  ;;  %v1093_v7 = vmax.f32 %v1077_v63, 0.0  ;;  %v1979_v10 = vpop.f32.mrb[8].mxu0  ;;  %1989 = vmatprep.mubr.msk.bf16.mxu1 %vm559_vm1, %v2178_v2 }
 0x195   : > { %1171 = vst.msk [vmem:[#allocation3 + $0xc] sm:$0xf] %vm326_vm0, %v1828_v0  ;;  %v1829_v24 = vpack.c.bf16 %v1095_v1, %v1095_v1  ;;  %v2029_v11 = vadd.f32 %v1979_v10, %v1939_v13  ;;  %v1018_v27 = vpop.f32.mrb[9].mxu0 }
 0x196   : > { %1170 = vst.msk [vmem:[#allocation3 + $0x8] sm:$0xf] %vm326_vm0, %v1826_v3  ;;  %v1827_v12 = vpack.c.bf16 %v1093_v7, %v1093_v7  ;;  %v2030_v28 = vadd.f32 %v1018_v27, %v650_v14  ;;  %v1980_v30 = vpop.f32.mrb[10].mxu0 }
 0x197   : > { %1180 = vst.msk [vmem:[#allocation4 + $0x10] sm:$0xf] %vm326_vm0, %v1829_v24  ;;  %v1082_v33 = vadd.f32 %v2029_v11, %v2764_v23  ;;  %v2031_v4 = vadd.f32 %v1980_v30, %v1940_v15  ;;  %v1021_v34 = vpop.f32.mrb[11].mxu0  ;;  %v2189_v24 = vld [vmem:[#allocation10 + $0x28] sm:$0xff]  }
 0x198   : > { %1179 = vst.msk [vmem:[#allocation4 + $0xc] sm:$0xf] %vm326_vm0, %v1827_v12  ;;  %v1080_v35 = vadd.f32 %v2030_v28, %v2764_v23  ;;  %v2032_v38 = vadd.f32 %v1021_v34, %v653_v16  ;;  %v2191_v12 = vld [vmem:[#allocation4 + $0x4] sm:$0xff]   ;;  %v427_v34 = vmax.f32 %v2645_v46, %v2647_v47 }
 0x199   : > { %v1098_v13 = vmax.f32 %v1082_v33, 0.0  ;;  %v1083_v8 = vadd.f32 %v2031_v4, %v2764_v23  ;;  %v1817_v4 = vld [vmem:[%s2909_s6] ss:$0 sm:$0xff] }
 0x19a   : > { %v1096_v39 = vmax.f32 %v1080_v35, 0.0  ;;  %v1081_v40 = vadd.f32 %v2032_v38, %v2764_v23  ;;  %v425_v38 = vmax.f32 %v2616_v25, %v2618_v26 }
 0x19b   : > { %v1832_v41 = vpack.c.bf16 %v1098_v13, %v1098_v13  ;;  %v1099_v14 = vmax.f32 %v1083_v8, 0.0 }
 0x19c   : > { %v1830_v42 = vpack.c.bf16 %v1096_v39, %v1096_v39  ;;  %v1097_v43 = vmax.f32 %v1081_v40, 0.0  ;;  %v1983_v44 = vpop.f32.mrb[12].mxu0  ;;  %v428_v39 = vmax.f32 %v2649_v48, %v2664_v59  ;;  %v429_v59 = vmax.f32 %v2666_v60, %v2679_v9 }
 0x19d   : > { %1173 = vst.msk [vmem:[#allocation3 + $0x14] sm:$0xf] %vm326_vm0, %v1832_v41  ;;  %v1833_v15 = vpack.c.bf16 %v1099_v14, %v1099_v14  ;;  %v2033_v45 = vadd.f32 %v1983_v44, %v2753_v17  ;;  %v1034_v49 = vpop.f32.mrb[13].mxu0  ;;  %v2180_v50 = vld [vmem:[#allocation3 + $0x8] sm:$0xff]   ;;  %v426_v14 = vmax.f32 %v2630_v36, %v2632_v37  ;;  %v431_v36 = vmax.f32 %v2701_v29, %v2706_v31 }
 0x19e   : > { %1172 = vst.msk [vmem:[#allocation3 + $0x10] sm:$0xf] %vm326_vm0, %v1830_v42  ;;  %v1831_v16 = vpack.c.bf16 %v1097_v43, %v1097_v43  ;;  %v2034_v52 = vadd.f32 %v1034_v49, %v2755_v19  ;;  %v1984_v53 = vpop.f32.mrb[14].mxu0  ;;  %1990 = vmatmul.mubr.msk.bf16.vlgmr.msra.gmra.mrb[12].mxu1 %vm559_vm1, %v2180_v50  ;;  %v430_v31 = vmax.f32 %v2687_v18, %v2693_v22 }
 0x19f   : > { %1182 = vst.msk [vmem:[#allocation4 + $0x18] sm:$0xf] %vm326_vm0, %v1833_v15  ;;  %v1086_v54 = vadd.f32 %v2033_v45, %v2764_v23  ;;  %v2035_v55 = vadd.f32 %v1984_v53, %v2757_v20  ;;  %v1037_v56 = vpop.f32.mrb[15].mxu0  ;;  %1998 = vmatpush3.bf16.msra.mxu1 %v2750_v6  ;;  %v2187_v10 = vld [vmem:[#allocation4 + $0x8] sm:$0xff]  }
 0x1a0   : > { %1181 = vst.msk [vmem:[#allocation4 + $0x14] sm:$0xf] %vm326_vm0, %v1831_v16  ;;  %v1084_v17 = vadd.f32 %v2034_v52, %v2764_v23  ;;  %v2036_v57 = vadd.f32 %v1037_v56, %v2759_v21  ;;  %1999 = vmatprep.subr.bf16.mxu1 %v2183_v51  ;;  %v2192_v28 = vld [vmem:[#allocation4 + $0xc] sm:$0xff]   ;;  %v432_v16 = vmax.f32 %v2708_v32, %v2721_v5 }
 0x1a1   : > { %v1102_v58 = vmax.f32 %v1086_v54, 0.0  ;;  %v1087_v19 = vadd.f32 %v2035_v55, %v2764_v23 }
 0x1a2   : > { %v1100_v62 = vmax.f32 %v1084_v17, 0.0  ;;  %v1085_v63 = vadd.f32 %v2036_v57, %v2764_v23  ;;  %v2185_v23 = vld [vmem:[#allocation4] sm:$0xff]  }
 0x1a3   : > { %v1836_v20 = vpack.c.bf16 %v1102_v58, %v1102_v58  ;;  %v1103_v0 = vmax.f32 %v1087_v19, 0.0  ;;  %2000 = vmatpush3.bf16.msra.mxu1 %v2183_v51 }
 0x1a4   : > { %v1834_v1 = vpack.c.bf16 %v1100_v62, %v1100_v62  ;;  %v1101_v2 = vmax.f32 %v1085_v63, 0.0  ;;  %2009 = vmatprep.subr.bf16.mxu1 %v2186_v61 }
 0x1a5   : > { %1175 = vst.msk [vmem:[#allocation3 + $0x1c] sm:$0xf] %vm326_vm0, %v1836_v20  ;;  %v1837_v3 = vpack.c.bf16 %v1103_v0, %v1103_v0  ;;  %v2182_v7 = vld [vmem:[#allocation3 + $0x10] sm:$0xff]  }
 0x1a6   : > { %1174 = vst.msk [vmem:[#allocation3 + $0x18] sm:$0xf] %vm326_vm0, %v1834_v1  ;;  %v1835_v6 = vpack.c.bf16 %v1101_v2, %v1101_v2  ;;  %1993 = vmatprep.mubr.msk.bf16.mxu1 %vm559_vm1, %v2182_v7 }
 0x1a7   : > { %1184 = vst.msk [vmem:[#allocation4 + $0x20] sm:$0xf] %vm326_vm0, %v1837_v3  ;;  %v2188_v11 = vld [vmem:[#allocation4 + $0x10] sm:$0xff]  }
 0x1a8   : > { %1183 = vst.msk [vmem:[#allocation4 + $0x1c] sm:$0xf] %vm326_vm0, %v1835_v6  ;;  %v2193_v30 = vld [vmem:[#allocation4 + $0x14] sm:$0xff]  }
 0x1ad   : > { %v2184_v21 = vld [vmem:[#allocation3 + $0x18] sm:$0xff]  }
 0x1ae   : > { %1994 = vmatmul.mubr.msk.bf16.gmra.mrb[16].mxu1 %vm559_vm1, %v2184_v21 }
 0x1af   : > { %2001 = vmatprep.mubr.msk.bf16.mxu1 %vm559_vm1, %v2185_v23  ;;  %v2190_v27 = vld [vmem:[#allocation4 + $0x18] sm:$0xff]  }
 0x1b0   : > { %v2194_v33 = vld [vmem:[#allocation4 + $0x1c] sm:$0xff]  }
 0x1b6   : > { %2002 = vmatmul.mubr.msk.bf16.vlgmr.msra.gmra.mrb[12].mxu1 %vm559_vm1, %v2187_v10 }
 0x1b7   : > { %2010 = vmatpush3.bf16.msra.mxu1 %v2186_v61  ;;  %2005 = vmatprep.mubr.msk.bf16.mxu1 %vm559_vm1, %v2188_v11 }
 0x1b8   : > { %2011 = vmatprep.subr.bf16.mxu1 %v2189_v24 }
 0x1bb   : > { %2012 = vmatpush3.bf16.msra.mxu1 %v2189_v24 }
 0x1be   : > { %2006 = vmatmul.mubr.msk.bf16.gmra.mrb[16].mxu1 %vm559_vm1, %v2190_v27 }
 0x1bf   : > { %2013 = vmatprep.mubr.msk.bf16.mxu1 %vm559_vm1, %v2191_v12 }
 0x1c6   : > { %2014 = vmatmul.mubr.msk.bf16.vlgmr.msra.gmra.mrb[12].mxu1 %vm559_vm1, %v2192_v28 }
 0x1c7   : > { %2017 = vmatprep.mubr.msk.bf16.mxu1 %vm559_vm1, %v2193_v30 }
 0x1ce   : > { %2018 = vmatmul.mubr.msk.bf16.gmra.mrb[16].mxu1 %vm559_vm1, %v2194_v33 }
 0x299   : > { %v2015_v35 = vpop.f32.mrb[12].mxu1 }
 0x29a   : > { %v1567_v13 = vadd.f32 %v2015_v35, %v1817_v4  ;;  %v1519_v8 = vpop.f32.mrb[13].mxu1 }
 0x29b   : > { %v1565_v40 = vadd.f32 %v1817_v4, %v1519_v8  ;;  %v2016_v41 = vpop.f32.mrb[14].mxu1 }
 0x29c   : > { %v1575_v42 = vadd.f32 %v1567_v13, %v427_v34  ;;  %v1568_v43 = vadd.f32 %v2016_v41, %v1817_v4  ;;  %v1522_v44 = vpop.f32.mrb[15].mxu1 }
 0x29d   : > { %v1573_v15 = vadd.f32 %v1565_v40, %v425_v38  ;;  %v1566_v46 = vadd.f32 %v1817_v4, %v1522_v44 }
 0x29e   : > { %v1583_v47 = vpack.c.bf16 %v1575_v42, %v1575_v42  ;;  %v1576_v45 = vadd.f32 %v1568_v43, %v428_v39 }
 0x29f   : > { %v1581_v49 = vpack.c.bf16 %v1573_v15, %v1573_v15  ;;  %v1574_v25 = vadd.f32 %v1566_v46, %v426_v14 }
 0x2a0   : > { %1591 = vst.msk [vmem:[%s2827_s21 + $0x8] sm:$0xf] %vm326_vm0, %v1583_v47  ;;  %v1584_v26 = vpack.c.bf16 %v1576_v45, %v1576_v45 }
 0x2a1   : > { %1589 = vst.msk [vmem:[%s2827_s21] sm:$0xf] %vm326_vm0, %v1581_v49  ;;  %v1582_v37 = vpack.c.bf16 %v1574_v25, %v1574_v25  ;;  %v2019_v48 = vpop.f32.mrb[16].mxu1 }
 0x2a2   : > { %1592 = vst.msk [vmem:[%s2827_s21 + $0xc] sm:$0xf] %vm326_vm0, %v1584_v26  ;;  %v1571_v50 = vadd.f32 %v2019_v48, %v1817_v4  ;;  %v1535_v51 = vpop.f32.mrb[17].mxu1 }
 0x2a3   : > { %1590 = vst.msk [vmem:[%s2827_s21 + $0x4] sm:$0xf] %vm326_vm0, %v1582_v37  ;;  %v1569_v52 = vadd.f32 %v1817_v4, %v1535_v51  ;;  %v2020_v29 = vpop.f32.mrb[18].mxu1 }
 0x2a4   : > { %v1579_v53 = vadd.f32 %v1571_v50, %v431_v36  ;;  %v1572_v60 = vadd.f32 %v2020_v29, %v1817_v4  ;;  %v1538_v9 = vpop.f32.mrb[19].mxu1 }
 0x2a5   : > { %v1577_v54 = vadd.f32 %v1569_v52, %v429_v59  ;;  %v1570_v55 = vadd.f32 %v1817_v4, %v1538_v9 }
 0x2a6   : > { %v1587_v32 = vpack.c.bf16 %v1579_v53, %v1579_v53  ;;  %v1580_v5 = vadd.f32 %v1572_v60, %v432_v16 }
 0x2a7   : > { %v1585_v56 = vpack.c.bf16 %v1577_v54, %v1577_v54  ;;  %v1578_v18 = vadd.f32 %v1570_v55, %v430_v31 }
 0x2a8   : > { %1595 = vst.msk [vmem:[%s2827_s21 + $0x18] sm:$0xf] %vm326_vm0, %v1587_v32  ;;  %v1588_v22 = vpack.c.bf16 %v1580_v5, %v1580_v5 }
 0x2a9   : > { %1593 = vst.msk [vmem:[%s2827_s21 + $0x10] sm:$0xf] %vm326_vm0, %v1585_v56  ;;  %v1586_v17 = vpack.c.bf16 %v1578_v18, %v1578_v18 }
 0x2aa   : > { %1596 = vst.msk [vmem:[%s2827_s21 + $0x1c] sm:$0xf] %vm326_vm0, %v1588_v22 }
 0x2ab   : > { %1594 = vst.msk [vmem:[%s2827_s21 + $0x14] sm:$0xf] %vm326_vm0, %v1586_v17 }
 0x2ac   : > { %2294 = shalt.err (!%p2291_p5)
}
 0x2ad   : > { %s2295_s11 = scalar_lea.hbm %s2854_s29, 512  ;;  %s2299_s9 = scalar_lea.hbm %s2910_s7, 2048 }
 0x2ae   : > { %p2296_p11 = scmp.ne.s32.totalorder %s2854_s29, %s2295_s11  ;;  %p2300_p6 = scmp.lt.u32.totalorder %s2854_s29, %s2910_s7 }
 0x2af   : > { %p2301_p7 = scmp.lt.u32.totalorder %s2299_s9, %s2295_s11  ;;  %p2303_p8 = scmp.lt.u32.totalorder %s2295_s11, %s2854_s29 }
 0x2b0   : > { %p2297_p12 = pnand %p2296_p11, %p2936_p9 }
 0x2b1   : > { %p2302_p13 = por %p2301_p7, %p2300_p6 }
 0x2b2   : > { %p2298_p3 = pneg %p2297_p12 }
 0x2b3   : > { %p2304_p10 = por %p2303_p8, %p2302_p13 }
 0x2b5   : > { %p2305_p1 = pnand %p2304_p10, %p2298_p3 }
 0x2b7   : > { %2308 = shalt.err (!%p2305_p1)
}
 0x2b8   : > { %s2361_s20 = smov 64   ;;  %s2362_s19 = smov 256  }
 0x2b9   : > { %s2363_s17 = smov 4  }
 0x2ba   : > { %2083 = dma.vmem_to_hbm [thread:$0]  (%p2936_p9), %s2847_s10, 512, %s2854_s29, %s1598_s28, %s2361_s20, %s2362_s19, %s2363_s17  }
 0x2bb PF: > { %p2105_p4 = scmp.ge.s32.totalorder %s2351_s27, 2  ;;  %s1625_s12 = sand.u32 1, %s2339_s24  }
 0x2bc   : > { %p2937_p0 = scmp.ne.s32.totalorder %s2924_s14, 0  ;;  %s1626_s15 = scalar_lea.sflag [#allocation7], %s1625_s12 }
 0x2be   : > { %p2097_p2 = pnand %p2105_p4, %p2937_p0 }
 0x2c0   : > { %2334 = dma.done.wait (!%p2097_p2), %s1626_s15, 512  }
 0x2c1   : > { %2336 = vsyncadd (!%p2097_p2), %s1626_s15, 4294966784  ;;  %s2938_s27 = sld [smem:[#allocation15_spill]]  ;;  %s2939_s22 = sld [smem:[#allocation16_spill]] }
 0x2c2   : > { %s2940_s24 = smov %s2343_s25  ;;  %s2941_s25 = smov %s2347_s26 }
 0x2c7   : > { %p21_p5 = scmp.ge.s32.totalorder %s2938_s27, 6   ;;  %s2942_s26 = smov %s2939_s22 }
 0x2c9   :  { %23 = sbr.rel (!%p21_p5) target bundleno = 6 (0x6), region = 109 }
 0x2d0   :  { %1631 = vsyncpa [#allocation6], 1 }
 0x2d1   :  { %1633 = vsyncpa [#allocation6 + $0x1], 1 }
 0x2d2   :  { %1634 = vsyncpa [#allocation9], 1 }
 0x2d3   :  { %1635 = vsyncpa [#allocation7], 1 }
 0x2d4   :  { %1637 = vsyncpa [#allocation7 + $0x1], 1 }

</bundles_post_ra>
